<compile_context>
chip_gen: v7x
topology: tpu7x:2x2x1
jax: 0.10.0
libtpu: 0.0.40
codegen_flags: <defaults>
</compile_context>

<pallas_src>
import functools

import jax
import jax.numpy as jnp
from jax import lax
from jax.experimental import pallas as pl
from jax.experimental.pallas import tpu as pltpu


# ----------------------------------------------------------------------------
# Tile selection helpers
# ----------------------------------------------------------------------------
def _pick_batch_tile(B):
    if B <= 8:
        return B
    return 8 if B % 8 == 0 else 1


def _pick_hw_tile(HW, C, tb, itemsize, cap=2048, budget=12 * 1024 * 1024):
    """Largest multiple of 128 <= min(HW, cap) whose double-buffered x tile fits budget."""
    if HW < 128:
        return HW
    t = min((HW // 128) * 128, cap)
    while t > 128 and 2 * tb * C * t * itemsize > budget:
        t -= 128
    return t


# ----------------------------------------------------------------------------
# Kernel 1: ChannelAttention — streaming global avg/max pool + fused tiny MLP
# ----------------------------------------------------------------------------
def _channel_attention_kernel(x_ref, w1t_ref, w2t_ref, out_ref, acc_ref,
                              *, hw_total, t_hw, tb, needs_mask):
    # acc_ref: (2*tb, C) f32; rows [0:tb] = running mean, rows [tb:2tb] = running max.
    k = pl.program_id(1)
    C = acc_ref.shape[1]

    @pl.when(k == 0)
    def _init():
        acc_ref[0:tb, :] = jnp.zeros((tb, C), jnp.float32)
        acc_ref[tb:2 * tb, :] = jnp.full((tb, C), -jnp.inf, jnp.float32)

    x = x_ref[...].astype(jnp.float32)                       # (tb, C, t_hw)
    if needs_mask:
        col = lax.broadcasted_iota(jnp.int32, x.shape, 2) + k * t_hw
        valid = col < hw_total
        x_sum = jnp.where(valid, x, 0.0)
        x_max = jnp.where(valid, x, -jnp.inf)
    else:
        x_sum = x
        x_max = x

    acc_ref[0:tb, :] += jnp.sum(x_sum, axis=-1) * (1.0 / float(hw_total))
    acc_ref[tb:2 * tb, :] = jnp.maximum(acc_ref[tb:2 * tb, :],
                                        jnp.max(x_max, axis=-1))

    @pl.when(k == pl.num_programs(1) - 1)
    def _finalize():
        pooled = acc_ref[...]                                # (2*tb, C): [avg; max]
        h = jnp.maximum(
            jnp.dot(pooled, w1t_ref[...], preferred_element_type=jnp.float32), 0.0)
        y = jnp.dot(h, w2t_ref[...], preferred_element_type=jnp.float32)
        out_ref[...] = (y[0:tb, :] + y[tb:2 * tb, :]).astype(out_ref.dtype)


def channel_attention_scale(x_flat, w1, w2):
    """x_flat: (B, C, HW); w1: (Cr, C); w2: (C, Cr). Returns (B, C) f32 scale."""
    B, C, HW = x_flat.shape
    Cr = w1.shape[0]
    w1t = jnp.transpose(w1).astype(jnp.float32)              # (C, Cr)
    w2t = jnp.transpose(w2).astype(jnp.float32)              # (Cr, C)

    itemsize = jnp.dtype(x_flat.dtype).itemsize
    tb = _pick_batch_tile(B)
    t_hw = _pick_hw_tile(HW, C, tb, itemsize)
    needs_mask = (HW % t_hw) != 0
    grid = (pl.cdiv(B, tb), pl.cdiv(HW, t_hw))

    kernel = functools.partial(_channel_attention_kernel, hw_total=HW,
                               t_hw=t_hw, tb=tb, needs_mask=needs_mask)
    return pl.pallas_call(
        kernel,
        out_shape=jax.ShapeDtypeStruct((B, C), jnp.float32),
        grid=grid,
        in_specs=[
            pl.BlockSpec((tb, C, t_hw), lambda b, k: (b, 0, k)),   # streamed x tiles
            pl.BlockSpec((C, Cr), lambda b, k: (0, 0)),            # resident weights
            pl.BlockSpec((Cr, C), lambda b, k: (0, 0)),
        ],
        out_specs=pl.BlockSpec((tb, C), lambda b, k: (b, 0)),      # indexed by b only
        scratch_shapes=[pltpu.VMEM((2 * tb, C), jnp.float32)],
        compiler_params=pltpu.CompilerParams(
            dimension_semantics=("parallel", "arbitrary"),
            vmem_limit_bytes=32 * 1024 * 1024),
        cost_estimate=pl.CostEstimate(
            flops=2 * B * C * HW + 8 * B * C * Cr,
            transcendentals=0,
            bytes_accessed=B * C * HW * itemsize + (2 * C * Cr + B * C) * 4),
    )(x_flat, w1t, w2t)


# ----------------------------------------------------------------------------
# Kernel 2: channel mean/max of (x * ca) — written into one (B, 2, HW) slab
# ----------------------------------------------------------------------------
def _spatial_pool_kernel(x_ref, ca_ref, out_ref):
    x = x_ref[...].astype(jnp.float32)                       # (tb, C, t)
    ca = ca_ref[...][:, :, None]                             # (tb, C, 1)
    x1 = x * ca
    inv_c = 1.0 / float(x.shape[1])
    out_ref[:, 0, :] = (jnp.sum(x1, axis=1) * inv_c).astype(out_ref.dtype)
    out_ref[:, 1, :] = jnp.max(x1, axis=1).astype(out_ref.dtype)


def spatial_channel_pool(x_flat, ca):
    """Returns (B, 2, HW) f32: channel-mean and channel-max of x*ca."""
    B, C, HW = x_flat.shape
    itemsize = jnp.dtype(x_flat.dtype).itemsize
    tb = _pick_batch_tile(B)
    t_hw = _pick_hw_tile(HW, C, tb, itemsize)
    grid = (pl.cdiv(B, tb), pl.cdiv(HW, t_hw))
    return pl.pallas_call(
        _spatial_pool_kernel,
        out_shape=jax.ShapeDtypeStruct((B, 2, HW), jnp.float32),
        grid=grid,
        in_specs=[pl.BlockSpec((tb, C, t_hw), lambda b, k: (b, 0, k)),
                  pl.BlockSpec((tb, C), lambda b, k: (b, 0))],
        out_specs=pl.BlockSpec((tb, 2, t_hw), lambda b, k: (b, 0, k)),
        compiler_params=pltpu.CompilerParams(
            dimension_semantics=("parallel", "parallel"),
            vmem_limit_bytes=32 * 1024 * 1024),
        cost_estimate=pl.CostEstimate(
            flops=3 * B * C * HW,
            transcendentals=0,
            bytes_accessed=B * C * HW * itemsize + B * 2 * HW * 4),
    )(x_flat, ca)


# ----------------------------------------------------------------------------
# Kernel 3: SpatialAttention 7x7 conv (2 -> 1 channel, zero pad 3)
# ----------------------------------------------------------------------------
def _spatial_conv_kernel(xpad_ref, w_ref, out_ref, *, H, W):
    xp = xpad_ref[...].astype(jnp.float32)                   # (1, 2, H+6, W+6)
    acc = jnp.zeros((H, W), jnp.float32)
    for c in range(2):
        xc = xp[0, c]                                        # (H+6, W+6)
        for dy in range(7):
            for dx in range(7):
                acc = acc + w_ref[c * 49 + dy * 7 + dx] * xc[dy:dy + H, dx:dx + W]
    out_ref[0] = acc.astype(out_ref.dtype)


def spatial_attention_map(pooled_img, w_spatial):
    """pooled_img: (B, 2, H, W); w_spatial: (1, 2, 7, 7). Returns (B, H, W) f32."""
    B, _, H, W = pooled_img.shape
    xpad = jnp.pad(pooled_img.astype(jnp.float32),
                   ((0, 0), (0, 0), (3, 3), (3, 3)))
    w_flat = w_spatial.reshape(-1).astype(jnp.float32)       # (98,)
    kernel = functools.partial(_spatial_conv_kernel, H=H, W=W)
    return pl.pallas_call(
        kernel,
        out_shape=jax.ShapeDtypeStruct((B, H, W), jnp.float32),
        grid=(B,),
        in_specs=[pl.BlockSpec((1, 2, H + 6, W + 6), lambda b: (b, 0, 0, 0)),
                  pl.BlockSpec(memory_space=pltpu.MemorySpace.SMEM)],
        out_specs=pl.BlockSpec((1, H, W), lambda b: (b, 0, 0)),
        compiler_params=pltpu.CompilerParams(
            dimension_semantics=("parallel",),
            vmem_limit_bytes=32 * 1024 * 1024),
        cost_estimate=pl.CostEstimate(
            flops=2 * 98 * B * H * W,
            transcendentals=0,
            bytes_accessed=B * 2 * (H + 6) * (W + 6) * 4 + B * H * W * 4),
    )(xpad, w_flat)


# ----------------------------------------------------------------------------
# Kernel 4: fused elementwise out = x * ca * sa
# ----------------------------------------------------------------------------
def _apply_scales_kernel(x_ref, ca_ref, sa_ref, out_ref):
    x = x_ref[...].astype(jnp.float32)                       # (tb, C, t)
    ca = ca_ref[...].astype(jnp.float32)[:, :, None]         # (tb, C, 1)
    sa = sa_ref[...].astype(jnp.float32)[:, None, :]         # (tb, 1, t)
    out_ref[...] = (x * ca * sa).astype(out_ref.dtype)


def apply_scales(x_flat, ca, sa_flat):
    B, C, HW = x_flat.shape
    itemsize = jnp.dtype(x_flat.dtype).itemsize
    tb = _pick_batch_tile(B)
    t_hw = _pick_hw_tile(HW, C, tb, itemsize, budget=8 * 1024 * 1024)
    grid = (pl.cdiv(B, tb), pl.cdiv(HW, t_hw))
    return pl.pallas_call(
        _apply_scales_kernel,
        out_shape=jax.ShapeDtypeStruct((B, C, HW), x_flat.dtype),
        grid=grid,
        in_specs=[pl.BlockSpec((tb, C, t_hw), lambda b, k: (b, 0, k)),
                  pl.BlockSpec((tb, C), lambda b, k: (b, 0)),
                  pl.BlockSpec((tb, t_hw), lambda b, k: (b, k))],
        out_specs=pl.BlockSpec((tb, C, t_hw), lambda b, k: (b, 0, k)),
        compiler_params=pltpu.CompilerParams(
            dimension_semantics=("parallel", "parallel"),
            vmem_limit_bytes=32 * 1024 * 1024),
        cost_estimate=pl.CostEstimate(
            flops=2 * B * C * HW,
            transcendentals=0,
            bytes_accessed=2 * B * C * HW * itemsize + B * (C + HW) * 4),
    )(x_flat, ca, sa_flat)


# ----------------------------------------------------------------------------
# Full CBAM forward
# ----------------------------------------------------------------------------
def cbam_forward(x_nchw, fc1_w, fc2_w, spatial_w):
    B, C, H, W = x_nchw.shape
    HW = H * W
    x_flat = x_nchw.reshape(B, C, HW)                        # keep native dtype (no upcast)

    ca = channel_attention_scale(x_flat, fc1_w, fc2_w)       # (B, C) f32
    pooled = spatial_channel_pool(x_flat, ca)                # (B, 2, HW) f32
    sa = spatial_attention_map(pooled.reshape(B, 2, H, W), spatial_w)  # (B, H, W) f32
    out = apply_scales(x_flat, ca, sa.reshape(B, HW))        # (B, C, HW)
    return out.reshape(B, C, H, W)


def cbam_reference(x, fc1_w, fc2_w, spatial_w):
    avg_p = jnp.mean(x, axis=(2, 3))
    max_p = jnp.max(x, axis=(2, 3))

    def mlp(p):
        return jnp.maximum(p @ fc1_w.T, 0.0) @ fc2_w.T

    ca = mlp(avg_p) + mlp(max_p)
    x1 = x * ca[:, :, None, None]
    avg_c = jnp.mean(x1, axis=1, keepdims=True)
    max_c = jnp.max(x1, axis=1, keepdims=True)
    cat = jnp.concatenate([avg_c, max_c], axis=1)
    sa = lax.conv_general_dilated(cat, spatial_w, window_strides=(1, 1),
                                  padding="SAME",
                                  dimension_numbers=("NCHW", "OIHW", "NCHW"))
    return x1 * sa


if __name__ == "__main__":
    B, C, H, W = 2, 32, 64, 64
    ratio, ksize = 8, 7
    Cr = C // ratio

    key = jax.random.PRNGKey(0)
    kx, k1, k2, k3 = jax.random.split(key, 4)
    x = jax.random.normal(kx, (B, C, H, W), dtype=jnp.float32)
    fc1_w = jax.random.normal(k1, (Cr, C), dtype=jnp.float32) * 0.1   # Conv2d 1x1, no bias
    fc2_w = jax.random.normal(k2, (C, Cr), dtype=jnp.float32) * 0.1   # Conv2d 1x1, no bias
    sp_w = jax.random.normal(k3, (1, 2, ksize, ksize), dtype=jnp.float32) * 0.1

    out = cbam_forward(x, fc1_w, fc2_w, sp_w)
    out = jax.block_until_ready(out)

    ref = cbam_reference(x, fc1_w, fc2_w, sp_w)
    assert out.shape == (B, C, H, W)
    assert jnp.allclose(out, ref, atol=1e-3, rtol=1e-3), float(
        jnp.max(jnp.abs(out - ref)))

    print("KERNEL_OK")
</pallas_src>

<mosaic_0001>
module attributes {stable_mosaic.version = 11 : i64} {
  func.func @_channel_attention_kernel(%arg0: i32, %arg1: i32, %arg2: memref<2x32x2048xf32, #tpu.memory_space<vmem>>, %arg3: memref<32x4xf32, #tpu.memory_space<vmem>>, %arg4: memref<4x32xf32, #tpu.memory_space<vmem>>, %arg5: memref<2x32xf32, #tpu.memory_space<vmem>>, %arg6: memref<4x32xf32, #tpu.memory_space<vmem>>) attributes {dimension_semantics = [#tpu.dimension_semantics<parallel>, #tpu.dimension_semantics<arbitrary>], iteration_bounds = array<i64: 1, 2>, scalar_prefetch = 0 : i64, scratch_operands = 1 : i64, tpu.core_type = #tpu.core_type<tc>, window_params = [{transform_indices = @transform_0, window_bounds = array<i64: 2, 32, 2048>}, {pipeline_mode = #tpu.pipeline_mode<synchronous>, transform_indices = @transform_1, window_bounds = array<i64: 32, 4>}, {pipeline_mode = #tpu.pipeline_mode<synchronous>, transform_indices = @transform_2, window_bounds = array<i64: 4, 32>}, {transform_indices = @transform_3, window_bounds = array<i64: 2, 32>}]} {
    %c0_i32 = arith.constant 0 : i32
    %0 = arith.cmpi eq, %arg1, %c0_i32 : i32
    %1 = arith.extui %0 : i1 to i32
    %c0_i32_0 = arith.constant 0 : i32
    %2 = arith.cmpi ne, %1, %c0_i32_0 : i32
    scf.if %2 {
      %cst_13 = arith.constant 0.000000e+00 : f32
      %17 = vector.broadcast %cst_13 : f32 to vector<2x32xf32>
      %c0_14 = arith.constant 0 : index
      %c0_15 = arith.constant 0 : index
      %18 = vector.load %arg6[%c0_14, %c0_15] : memref<4x32xf32, #tpu.memory_space<vmem>>, vector<2x32xf32>
      tpu.vector_store %arg6[%c0_14, %c0_15], %17 {strides = array<i32>} : memref<4x32xf32, #tpu.memory_space<vmem>>, vector<2x32xf32>,
      %cst_16 = arith.constant 0xFF800000 : f32
      %19 = vector.broadcast %cst_16 : f32 to vector<2x32xf32>
      %c2_17 = arith.constant 2 : index
      %c0_18 = arith.constant 0 : index
      %20 = vector.load %arg6[%c2_17, %c0_18] : memref<4x32xf32, #tpu.memory_space<vmem>>, vector<2x32xf32>
      tpu.vector_store %arg6[%c2_17, %c0_18], %19 {strides = array<i32>} : memref<4x32xf32, #tpu.memory_space<vmem>>, vector<2x32xf32>,
    } else {
    }
    %c0 = arith.constant 0 : index
    %c0_1 = arith.constant 0 : index
    %c0_2 = arith.constant 0 : index
    %3 = vector.load %arg2[%c0, %c0_1, %c0_2] : memref<2x32x2048xf32, #tpu.memory_space<vmem>>, vector<2x32x2048xf32>
    %c0_3 = arith.constant 0 : index
    %c0_4 = arith.constant 0 : index
    %4 = vector.load %arg6[%c0_3, %c0_4] : memref<4x32xf32, #tpu.memory_space<vmem>>, vector<2x32xf32>
    %cst = arith.constant dense<0.000000e+00> : vector<2x32xf32>
    %5 = vector.multi_reduction <add>, %3, %cst [2] : vector<2x32x2048xf32> to vector<2x32xf32>
    %cst_5 = arith.constant 2.44140625E-4 : f32
    %6 = vector.broadcast %cst_5 : f32 to vector<2x32xf32>
    %7 = arith.mulf %5, %6 : vector<2x32xf32>
    %8 = arith.addf %4, %7 : vector<2x32xf32>
    %c0_6 = arith.constant 0 : index
    %c0_7 = arith.constant 0 : index
    %9 = vector.load %arg6[%c0_6, %c0_7] : memref<4x32xf32, #tpu.memory_space<vmem>>, vector<2x32xf32>
    tpu.vector_store %arg6[%c0_6, %c0_7], %8 {strides = array<i32>} : memref<4x32xf32, #tpu.memory_space<vmem>>, vector<2x32xf32>,
    %c2 = arith.constant 2 : index
    %c0_8 = arith.constant 0 : index
    %10 = vector.load %arg6[%c2, %c0_8] : memref<4x32xf32, #tpu.memory_space<vmem>>, vector<2x32xf32>
    %cst_9 = arith.constant dense<0xFF800000> : vector<2x32xf32>
    %11 = vector.multi_reduction <maximumf>, %3, %cst_9 [2] : vector<2x32x2048xf32> to vector<2x32xf32>
    %12 = arith.maximumf %10, %11 : vector<2x32xf32>
    %c2_10 = arith.constant 2 : index
    %c0_11 = arith.constant 0 : index
    %13 = vector.load %arg6[%c2_10, %c0_11] : memref<4x32xf32, #tpu.memory_space<vmem>>, vector<2x32xf32>
    tpu.vector_store %arg6[%c2_10, %c0_11], %12 {strides = array<i32>} : memref<4x32xf32, #tpu.memory_space<vmem>>, vector<2x32xf32>,
    %c1_i32 = arith.constant 1 : i32
    %14 = arith.cmpi eq, %arg1, %c1_i32 : i32
    %15 = arith.extui %14 : i1 to i32
    %c0_i32_12 = arith.constant 0 : i32
    %16 = arith.cmpi ne, %15, %c0_i32_12 : i32
    scf.if %16 {
      %c0_13 = arith.constant 0 : index
      %c0_14 = arith.constant 0 : index
      %17 = vector.load %arg6[%c0_13, %c0_14] : memref<4x32xf32, #tpu.memory_space<vmem>>, vector<4x32xf32>
      %c0_15 = arith.constant 0 : index
      %c0_16 = arith.constant 0 : index
      %18 = vector.load %arg3[%c0_15, %c0_16] : memref<32x4xf32, #tpu.memory_space<vmem>>, vector<32x4xf32>
      %cst_17 = arith.constant dense<0.000000e+00> : vector<4x4xf32>
      %19 = tpu.matmul %17, %18, %cst_17 {dimension_numbers = #tpu.dot_dimension_numbers<[1], [0], [0], [1], [0, 0, 1, 1], [], []>} : vector<4x32xf32>, vector<32x4xf32>, vector<4x4xf32> -> vector<4x4xf32>
      %cst_18 = arith.constant 0.000000e+00 : f32
      %20 = vector.broadcast %cst_18 : f32 to vector<4x4xf32>
      %21 = arith.maximumf %19, %20 : vector<4x4xf32>
      %c0_19 = arith.constant 0 : index
      %c0_20 = arith.constant 0 : index
      %22 = vector.load %arg4[%c0_19, %c0_20] : memref<4x32xf32, #tpu.memory_space<vmem>>, vector<4x32xf32>
      %cst_21 = arith.constant dense<0.000000e+00> : vector<4x32xf32>
      %23 = tpu.matmul %21, %22, %cst_21 {dimension_numbers = #tpu.dot_dimension_numbers<[1], [0], [0], [1], [0, 0, 1, 1], [], []>} : vector<4x4xf32>, vector<4x32xf32>, vector<4x32xf32> -> vector<4x32xf32>
      %24 = vector.extract_strided_slice %23 {offsets = [0, 0], sizes = [2, 32], strides = [1, 1]} : vector<4x32xf32> to vector<2x32xf32>
      %25 = vector.extract_strided_slice %23 {offsets = [2, 0], sizes = [2, 32], strides = [1, 1]} : vector<4x32xf32> to vector<2x32xf32>
      %26 = arith.addf %24, %25 : vector<2x32xf32>
      %c0_22 = arith.constant 0 : index
      %c0_23 = arith.constant 0 : index
      %27 = vector.load %arg5[%c0_22, %c0_23] : memref<2x32xf32, #tpu.memory_space<vmem>>, vector<2x32xf32>
      tpu.vector_store %arg5[%c0_22, %c0_23], %26 {strides = array<i32>} : memref<2x32xf32, #tpu.memory_space<vmem>>, vector<2x32xf32>,
    } else {
    }
    return
  }
  func.func @transform_0(%arg0: i32, %arg1: i32) -> (i32, i32, i32) {
    %c0_i32 = arith.constant 0 : i32
    %c0_i32_0 = arith.constant 0 : i32
    return %arg0, %c0_i32, %arg1 : i32, i32, i32
  }
  func.func @transform_1(%arg0: i32, %arg1: i32) -> (i32, i32) {
    %c0_i32 = arith.constant 0 : i32
    %c0_i32_0 = arith.constant 0 : i32
    %c0_i32_1 = arith.constant 0 : i32
    return %c0_i32, %c0_i32_0 : i32, i32
  }
  func.func @transform_2(%arg0: i32, %arg1: i32) -> (i32, i32) {
    %c0_i32 = arith.constant 0 : i32
    %c0_i32_0 = arith.constant 0 : i32
    %c0_i32_1 = arith.constant 0 : i32
    return %c0_i32, %c0_i32_0 : i32, i32
  }
  func.func @transform_3(%arg0: i32, %arg1: i32) -> (i32, i32) {
    %c0_i32 = arith.constant 0 : i32
    %c0_i32_0 = arith.constant 0 : i32
    return %arg0, %c0_i32 : i32, i32
  }
}

</mosaic_0001>

<bundles_post_ra>
// kernel: tpu_custom_call.1
= control target key start
LH: loop header
LB: loop body
LE: loop exit
PB: predicated region body
PF: predicated region fallthrough
CT: control target
= control target key end

     0   :  { %8 = vsyncpa [#allocation4], 0  ;;  %s1866_s0 = inlined_call_operand.hbm [shape: f32[2,32,4096], index: 0, kind: input, shape index: {}]   ;;  %s1867_s1 = inlined_call_operand.vmem [shape: f32[32,4], index: 1, kind: input, shape index: {}]   ;;  %s1868_s2 = inlined_call_operand.vmem [shape: f32[4,32], index: 2, kind: input, shape index: {}]   ;;  %s1869_s3 = inlined_call_operand.hbm [shape: f32[2,32], index: 3, kind: output, shape index: {}]  }
   0x1   :  { %10 = vsyncpa [#allocation4 + $0x1], 0 }
   0x2   :  { %11 = vsyncpa [#allocation5], 0  ;;  %s1228_s12 = smov 0   ;;  %s1230_s13 = smov 0  }
   0x3   :  { %s1232_s14 = smov 0   ;;  %s1234_s15 = smov 0  }
   0x4   :  { %s1236_s16 = smov 0   ;;  %s1238_s17 = smov 0  }
   0x5 LB: > { %s969_s18 = sadd.s32 4294967295, %s1196_s17   ;;  %s26_s19 = sadd.s32 1, %s1192_s16  ;;  %s1196_s17 = sphi %s1238_s17, %s17_s17   ;;  %s1192_s16 = sphi %s1236_s16, %s1919_s16   ;;  %s1188_s15 = sphi %s1234_s15, %s1918_s15   ;;  %s1184_s14 = sphi %s1232_s14, %s1917_s14   ;;  %s1180_s13 = sphi %s1230_s13, %s1916_s13   ;;  %s1176_s12 = sphi %s1228_s12, %s1915_s12  }
   0x6   : > { %p27_p0 = scmp.ge.s32.totalorder %s26_s19, 2  ;;  %s38_s20 = sadd.s32 1, %s1184_s14 }
   0x7   : > { %p45_p1 = scmp.ne.s32.totalorder %s1184_s14, %s1180_s13  ;;  %p46_p2 = scmp.eq.s32.totalorder %s1196_s17, 0 }
   0x8   : > { %s1921_s19 = smov (%p27_p0, %s26_s19), 0  ;;  %p51_p4 = scmp.ne.s32.totalorder %s1180_s13, %s1176_s12 }
   0x9   : > { %p1264_p3 = por %p46_p2, %p45_p1  ;;  %s34_s22 = ssub.s32 %s1192_s16, %s1921_s19 }
   0xa   : > { %p52_p5 = scmp.eq.s32.totalorder %s969_s18, 0  ;;  %p36_p6 = scmp.eq.s32.totalorder %s34_s22, 0 }
   0xb   : > { %p1026_p8 = scmp.lt.s32.totalorder %s1196_s17, 2  ;;  %s149_s25 = sand.u32 1, %s1184_s14  }
   0xc   : > { %p1273_p7 = por %p52_p5, %p51_p4  ;;  %s986_s26 = sshll.u32 %s1192_s16, 11 }
   0xd   : > { %s1279_s24 = scalar_select %p36_p6, %s1184_s14, %s38_s20  }
   0xe   : > { %s972_s27 = sshll.u32 %s149_s25, 10  ;;  %s1286_s30 = scalar_lea.hbm %s1866_s0, %s986_s26 }
   0xf   : > { %s153_s4 = scalar_lea.vmem [#allocation3], %s972_s27  ;;  %p1290_p9 = pnand %p1026_p8, %p1264_p3 }
  0x10   : > { %s163_s5 = sshll.u32 %s153_s4, 4  ;;  %s1297_s7 = scalar_lea.sflag [#allocation4], %s149_s25  ;;  %s1294_s5 = int_to_ptr.vmem [resolvable:$true] %s163_s5 }
  0x11   : > { %s1086_s8 = scalar_lea.hbm %s1286_s30, 16384  ;;  %p1088_p12 = pneg %p1290_p9 }
  0x12   : > { %p1087_p11 = scmp.ne.s32.totalorder %s1286_s30, %s1086_s8  ;;  %s1091_s11 = scalar_lea.hbm %s1866_s0, 32768 }
  0x13   : > { %p1092_p1 = scmp.lt.u32.totalorder %s1286_s30, %s1866_s0  ;;  %p1093_p2 = scmp.lt.u32.totalorder %s1091_s11, %s1086_s8 }
  0x14   : > { %p1089_p13 = pnand %p1088_p12, %p1087_p11  ;;  %p1095_p4 = scmp.lt.u32.totalorder %s1086_s8, %s1286_s30 }
  0x15   : > { %p1094_p3 = por %p1093_p2, %p1092_p1 }
  0x16   : > { %p1090_p0 = pneg %p1089_p13 }
  0x17   : > { %p1096_p5 = por %p1095_p4, %p1094_p3 }
  0x19   : > { %p1097_p6 = pnand %p1096_p5, %p1090_p0 }
  0x1b   : > { %1100 = shalt.err (!%p1097_p6)
}
  0x1c   : > { %s1101_s21 = scalar_lea.vmem %s1294_s5, 16384  ;;  %s1198_s22 = smov [#allocation3]  }
  0x1d   : > { %p1102_p8 = scmp.ne.s32.totalorder %s1294_s5, %s1101_s21  ;;  %s1106_s25 = sshll.u32 %s1198_s22, 4  ;;  %s1107_s25 = int_to_ptr.vmem [resolvable:$false] %s1106_s25 }
  0x1e   : > { %s1108_s26 = scalar_lea.vmem %s1107_s25, 32768  ;;  %p1109_p10 = scmp.lt.s32.totalorder %s1294_s5, %s1107_s25 }
  0x1f   : > { %p1104_p11 = pnand %p1102_p8, %p1088_p12  ;;  %p1110_p1 = scmp.lt.s32.totalorder %s1108_s26, %s1101_s21 }
  0x21   : > { %p1105_p13 = pneg %p1104_p11  ;;  %p1111_p2 = por %p1110_p1, %p1109_p10 }
  0x23   : > { %p1112_p3 = pnand %p1111_p2, %p1105_p13 }
  0x25   : > { %1115 = shalt.err (!%p1112_p3)
}
  0x26   : > { %s1199_s27 = smov 4096   ;;  %s1200_s28 = smov 2048  }
  0x27   : > { %s1201_s29 = smov 128   ;;  %p171_p12 = scmp.lt.s32.totalorder %s1196_s17, 3 }
  0x28   : > { %1025 = dma.hbm_to_vmem [thread:$0]  (!%p1290_p9), %s1286_s30, 16384, %s1294_s5, %s1297_s7, %s1199_s27, %s1200_s28, %s1201_s29  }
  0x29   : > { %p1885_p0 = scmp.ge.s32.totalorder %s1196_s17, 1 }
  0x2b   : > { %p172_p4 = pnand %p1885_p0, %p171_p12 }
  0x2d   : > { %175 = sbr.rel (%p172_p4) target bundleno = 766 (0x2fe), region = 32 }
  0x34   : > { %s177_s4 = sand.u32 1, %s1180_s13  }
  0x35   : > { %s976_s8 = sshll.u32 %s177_s4, 10  ;;  %s178_s9 = scalar_lea.sflag [#allocation4], %s177_s4 }
  0x36   : > { %s1329_s10 = scalar_lea.vmem [#allocation3], %s976_s8 }
  0x37   : > { %1167 = dma.done.wait (%p1273_p7), %s178_s9, 16384  }
  0x38   : > { %1169 = vsyncadd (%p1273_p7), %s178_s9, 4294950912  ;;  %p977_p10 = scmp.ne.s32.totalorder %s1188_s15, 0 }
  0x39   : > { %vm205_vm0 = vcmask (!%p977_p10), 254976   ;;  %v1202_v0 = vmov (!%p977_p10), 0.0   ;;  %v1203_v1 = vmov (!%p977_p10), -inf  }
  0x3a   : > { %204 = sbr.rel (%p977_p10) target bundleno = 65 (0x41), region = 40  ;;  %206 = vst.msk [vmem:[#allocation2] sm:$0x3] (!%p977_p10), %vm205_vm0, %v1202_v0  ;;  %207 = vst.msk [vmem:[#allocation2 + $0x2] sm:$0x3] (!%p977_p10), %vm205_vm0, %v1203_v1 }
  0x41 PF: > { %v1337_v2 = vld [vmem:[%s1329_s10 + $0x200] sm:$0xff]  ;;  %v1340_v3 = vld [vmem:[%s1329_s10 + $0x208] sm:$0xff]  ;;  %v1343_v4 = vld [vmem:[%s1329_s10 + $0x210] sm:$0xff]  ;;  %vm500_vm1 = vcmask 130112   ;;  %vm507_vm2 = vcmask 195712   ;;  %vm514_vm3 = vcmask 261312  }
  0x42   : > { %1886 = vst [vmem:[#allocation9_spill] sm:$0xff] %v1337_v2  ;;  %1887 = vst [vmem:[#allocation10_spill] sm:$0xff] %v1340_v3  ;;  %v405_v5 = vadd.f32 %v1340_v3, %v1337_v2  ;;  %v1350_v7 = vld [vmem:[%s1329_s10 + $0x218] sm:$0xff]  ;;  %v1354_v9 = vld [vmem:[%s1329_s10 + $0x220] sm:$0xff]  ;;  %vm535_vm4 = vcmask 1041409   ;;  %vm539_vm5 = vcmask 254976  }
  0x43   : > { %v1358_v11 = vld [vmem:[%s1329_s10] sm:$0xff]  ;;  %v1361_v12 = vld [vmem:[%s1329_s10 + $0x8] sm:$0xff]  ;;  %v1367_v14 = vld [vmem:[%s1329_s10 + $0x10] sm:$0xff]  ;;  %v611_v57 = vmax.f32 %v1350_v7, %v1343_v4  ;;  %p978_p7 = scmp.ne.s32.totalorder %s1188_s15, 1 }
  0x44   : > { %v406_v8 = vadd.f32 %v405_v5, %v1343_v4  ;;  %1888 = vst [vmem:[#allocation11_spill] sm:$0xff] %v1358_v11  ;;  %1889 = vst [vmem:[#allocation12_spill] sm:$0xff] %v1361_v12  ;;  %v1364_v13 = vld [vmem:[%s1329_s10 + $0x228] sm:$0xff]  ;;  %v337_v15 = vadd.f32 %v1361_v12, %v1358_v11  ;;  %v1375_v18 = vld [vmem:[%s1329_s10 + $0x18] sm:$0xff]  ;;  %vm1205_vm6 = vmmov (!%p978_p7), 0   ;;  %vm737_vm7 = vcmask (!%p978_p7), 261120  }
  0x45   : > { %v1378_v19 = vld [vmem:[%s1329_s10 + $0x230] sm:$0xff]  ;;  %v1383_v22 = vld [vmem:[%s1329_s10 + $0x20] sm:$0xff]  ;;  %v1386_v23 = vld [vmem:[%s1329_s10 + $0x238] sm:$0xff]  ;;  %vm817_vm8 = vcmask (!%p978_p7), 1043456   ;;  %vm813_vm9 = vcmask (!%p978_p7), 31744  }
  0x46   : > { %v407_v10 = vadd.f32 %v406_v8, %v1350_v7  ;;  %v338_v20 = vadd.f32 %v337_v15, %v1367_v14  ;;  %v1390_v25 = vld [vmem:[%s1329_s10 + $0x280] sm:$0xff]  ;;  %v1394_v27 = vld [vmem:[%s1329_s10 + $0x28] sm:$0xff]  ;;  %v1400_v29 = vld [vmem:[%s1329_s10 + $0x290] sm:$0xff]  ;;  %v543_v7 = vmax.f32 %v1375_v18, %v1367_v14  ;;  %v612_v14 = vmax.f32 %v611_v57, %v1354_v9 }
  0x47   : > { %v1397_v28 = vld [vmem:[%s1329_s10 + $0x288] sm:$0xff]  ;;  %v1403_v30 = vld [vmem:[%s1329_s10 + $0x240] sm:$0xff]  ;;  %v1410_v34 = vld [vmem:[%s1329_s10 + $0x30] sm:$0xff] }
  0x48   : > { %v408_v17 = vadd.f32 %v407_v10, %v1354_v9  ;;  %v339_v24 = vadd.f32 %v338_v20, %v1375_v18  ;;  %1890 = vst [vmem:[#allocation13_spill] sm:$0xff] %v1397_v28  ;;  %v422_v32 = vadd.f32 %v1397_v28, %v1390_v25  ;;  %v291_v35 = vld [vmem:[%s1329_s10 + $0x298] sm:$0xff]  ;;  %v1416_v37 = vld [vmem:[%s1329_s10 + $0x248] sm:$0xff]  ;;  %v1421_v40 = vld [vmem:[%s1329_s10 + $0x250] sm:$0xff] }
  0x49   : > { %v1425_v42 = vld [vmem:[%s1329_s10 + $0x38] sm:$0xff]  ;;  %v292_v43 = vld [vmem:[%s1329_s10 + $0x2a0] sm:$0xff]  ;;  %v1433_v47 = vld [vmem:[%s1329_s10 + $0x88] sm:$0xff] }
  0x4a   : > { %v409_v21 = vadd.f32 %v408_v17, %v1364_v13  ;;  %v340_v31 = vadd.f32 %v339_v24, %v1383_v22  ;;  %v423_v39 = vadd.f32 %v422_v32, %v1400_v29  ;;  %v1430_v46 = vld [vmem:[%s1329_s10 + $0x80] sm:$0xff]  ;;  %v226_v48 = vld [vmem:[%s1329_s10 + $0x90] sm:$0xff]  ;;  %v1441_v51 = vld [vmem:[%s1329_s10 + $0x2a8] sm:$0xff] }
  0x4b   : > { %v1438_v50 = vld [vmem:[%s1329_s10 + $0x40] sm:$0xff]  ;;  %v354_v52 = vadd.f32 %v1433_v47, %v1430_v46  ;;  %v1446_v53 = vld [vmem:[%s1329_s10 + $0x258] sm:$0xff]  ;;  %v1454_v59 = vld [vmem:[%s1329_s10 + $0x48] sm:$0xff] }
  0x4c   : > { %v410_v26 = vadd.f32 %v409_v21, %v1378_v19  ;;  %v341_v38 = vadd.f32 %v340_v31, %v1394_v27  ;;  %v424_v45 = vadd.f32 %v423_v39, %v291_v35  ;;  %v227_v56 = vld [vmem:[%s1329_s10 + $0x98] sm:$0xff]  ;;  %v1457_v60 = vld [vmem:[%s1329_s10 + $0x2b0] sm:$0xff]  ;;  %v1460_v63 = vld [vmem:[%s1329_s10 + $0x260] sm:$0xff]  ;;  %v628_v21 = vmax.f32 %v291_v35, %v1400_v29 }
  0x4d   : > { %v560_v61 = vmax.f32 %v227_v56, %v226_v48  ;;  %v355_v62 = vadd.f32 %v354_v52, %v226_v48  ;;  %v228_v5 = vld [vmem:[%s1329_s10 + $0xa0] sm:$0xff]  ;;  %v1469_v8 = vld [vmem:[%s1329_s10 + $0x50] sm:$0xff]  ;;  %v1472_v10 = vld [vmem:[%s1329_s10 + $0x2b8] sm:$0xff] }
  0x4e   : > { %v411_v33 = vadd.f32 %v410_v26, %v1386_v23  ;;  %v342_v44 = vadd.f32 %v341_v38, %v1410_v34  ;;  %v425_v55 = vadd.f32 %v424_v45, %v292_v43  ;;  %v1475_v17 = vld [vmem:[%s1329_s10 + $0x268] sm:$0xff]  ;;  %v1484_v31 = vld [vmem:[%s1329_s10 + $0x58] sm:$0xff]  ;;  %v1487_v32 = vld [vmem:[%s1329_s10 + $0x2c0] sm:$0xff] }
  0x4f   : > { %v356_v15 = vadd.f32 %v355_v62, %v227_v56  ;;  %v229_v26 = vld [vmem:[%s1329_s10 + $0xa8] sm:$0xff]  ;;  %v1490_v39 = vld [vmem:[%s1329_s10 + $0x270] sm:$0xff]  ;;  %v1498_v45 = vld [vmem:[%s1329_s10 + $0x60] sm:$0xff]  ;;  %v629_v56 = vmax.f32 %v628_v21, %v292_v43 }
  0x50   : > { %v412_v41 = vadd.f32 %v411_v33, %v1403_v30  ;;  %v343_v54 = vadd.f32 %v342_v44, %v1425_v42  ;;  %v426_v1 = vadd.f32 %v425_v55, %v1441_v51  ;;  %v561_v33 = vmax.f32 %v560_v61, %v228_v5  ;;  %v1501_v48 = vld [vmem:[%s1329_s10 + $0x2c8] sm:$0xff]  ;;  %v1504_v52 = vld [vmem:[%s1329_s10 + $0x278] sm:$0xff]  ;;  %v1517_v62 = vld [vmem:[%s1329_s10 + $0x2d0] sm:$0xff] }
  0x51   : > { %v357_v38 = vadd.f32 %v356_v15, %v228_v5  ;;  %v544_v44 = vmax.f32 %v543_v7, %v1383_v22  ;;  %1891 = vst [vmem:[#allocation14_spill] sm:$0xff] %v1504_v52  ;;  %v613_v22 = vmax.f32 %v612_v14, %v1364_v13  ;;  %v306_v5 = vld [vmem:[%s1329_s10 + $0x310] sm:$0xff]  ;;  %v1524_v15 = vld [vmem:[%s1329_s10 + $0xc0] sm:$0xff]  ;;  %v1530_v13 = vld [vmem:[%s1329_s10 + $0x308] sm:$0xff] }
  0x52   : > { %v413_v49 = vadd.f32 %v412_v41, %v1416_v37  ;;  %v344_v0 = vadd.f32 %v343_v54, %v1438_v50  ;;  %v427_v24 = vadd.f32 %v426_v1, %v1457_v60  ;;  %v230_v41 = vld [vmem:[%s1329_s10 + $0xb0] sm:$0xff]  ;;  %v1507_v54 = vld [vmem:[%s1329_s10 + $0x68] sm:$0xff]  ;;  %1893 = vst [vmem:[#allocation16_spill] sm:$0xff] %v1530_v13  ;;  %v1571_v6 = vld [vmem:[%s1329_s10 + $0x100] sm:$0xff] }
  0x53   : > { %v1535_v14 = vld [vmem:[%s1329_s10 + $0x70] sm:$0xff]  ;;  %1894 = vst [vmem:[#allocation17_spill] sm:$0xff] %v1571_v6  ;;  %v309_v3 = vld [vmem:[%s1329_s10 + $0x328] sm:$0xff]  ;;  %v1615_v12 = vld [vmem:[%s1329_s10 + $0x380] sm:$0xff] }
  0x54   : > { %v414_v58 = vadd.f32 %v413_v49, %v1421_v40  ;;  %v345_v20 = vadd.f32 %v344_v0, %v1454_v59  ;;  %v428_v35 = vadd.f32 %v427_v24, %v1472_v10  ;;  %v358_v49 = vadd.f32 %v357_v38, %v229_v26  ;;  %1896 = vst [vmem:[#allocation19_spill] sm:$0xff] %v1615_v12 }
  0x55   : > { %v562_v0 = vmax.f32 %v561_v33, %v229_v26  ;;  %v545_v26 = vmax.f32 %v544_v44, %v1394_v27  ;;  %v614_v27 = vmax.f32 %v613_v22, %v1378_v19  ;;  %v1549_v44 = vld [vmem:[%s1329_s10 + $0x78] sm:$0xff]  ;;  %v1561_v19 = vld [vmem:[%s1329_s10 + $0xd0] sm:$0xff] }
  0x56   : > { %v415_v4 = vadd.f32 %v414_v58, %v1446_v53  ;;  %v346_v29 = vadd.f32 %v345_v20, %v1469_v8  ;;  %v429_v57 = vadd.f32 %v428_v35, %v1487_v32  ;;  %v1512_v58 = vld [vmem:[%s1329_s10 + $0xb8] sm:$0xff]  ;;  %v359_v1 = vadd.f32 %v358_v49, %v230_v41  ;;  %v1527_v20 = vld [vmem:[%s1329_s10 + $0x300] sm:$0xff] }
  0x57   : > { %1892 = vst [vmem:[#allocation15_spill] sm:$0xff] %v1527_v20  ;;  %v1552_v49 = vld [vmem:[%s1329_s10 + $0x2e0] sm:$0xff] }
  0x58   : > { %v416_v18 = vadd.f32 %v415_v4, %v1460_v63  ;;  %v347_v55 = vadd.f32 %v346_v29, %v1484_v31  ;;  %v307_v4 = vld [vmem:[%s1329_s10 + $0x318] sm:$0xff]  ;;  %v430_v43 = vadd.f32 %v429_v57, %v1501_v48  ;;  %v360_v33 = vadd.f32 %v359_v1, %v1512_v58 }
  0x59   : > { %v645_v21 = vmax.f32 %v307_v4, %v306_v5  ;;  %v630_v29 = vmax.f32 %v629_v56, %v1441_v51  ;;  %v439_v51 = vadd.f32 %v1530_v13, %v1527_v20  ;;  %v1632_v20 = vld [vmem:[%s1329_s10 + $0xf8] sm:$0xff]  ;;  %v1636_v13 = vld [vmem:[%s1329_s10 + $0x348] sm:$0xff] }
  0x5a   : > { %v417_v9 = vadd.f32 %v416_v18, %v1475_v17  ;;  %v348_v7 = vadd.f32 %v347_v55, %v1498_v45  ;;  %v1538_v18 = vld [vmem:[%s1329_s10 + $0x2d8] sm:$0xff]  ;;  %v431_v35 = vadd.f32 %v430_v43, %v1517_v62  ;;  %v563_v55 = vmax.f32 %v562_v0, %v230_v41  ;;  %v1567_v0 = vld [vmem:[%s1329_s10 + $0x2e8] sm:$0xff] }
  0x5b   : > { %v361_v57 = vadd.f32 %v360_v33, %v1524_v15  ;;  %v243_v43 = vld [vmem:[%s1329_s10 + $0x118] sm:$0xff]  ;;  %v546_v41 = vmax.f32 %v545_v26, %v1410_v34  ;;  %v440_v33 = vadd.f32 %v439_v51, %v306_v5  ;;  %v615_v26 = vmax.f32 %v614_v27, %v1386_v23 }
  0x5c   : > { %v418_v61 = vadd.f32 %v417_v9, %v1490_v39  ;;  %v349_v38 = vadd.f32 %v348_v7, %v1507_v54  ;;  %v1545_v9 = vld [vmem:[%s1329_s10 + $0xc8] sm:$0xff]  ;;  %v432_v1 = vadd.f32 %v431_v35, %v1538_v18  ;;  %v242_v7 = vld [vmem:[%s1329_s10 + $0x110] sm:$0xff]  ;;  %v1580_v34 = vld [vmem:[%s1329_s10 + $0xd8] sm:$0xff]  ;;  %v564_v5 = vmax.f32 %v563_v55, %v1512_v58 }
  0x5d   : > { %v577_v35 = vmax.f32 %v243_v43, %v242_v7  ;;  %v441_v2 = vadd.f32 %v440_v33, %v307_v4  ;;  %v547_v27 = vmax.f32 %v546_v41, %v1425_v42  ;;  %v1598_v58 = vld [vmem:[%s1329_s10 + $0x2f8] sm:$0xff]  ;;  %v310_v42 = vld [vmem:[%s1329_s10 + $0x330] sm:$0xff] }
  0x5e   : > { %v419_v24 = vadd.f32 %v418_v61, %v1504_v52  ;;  %v308_v61 = vld [vmem:[%s1329_s10 + $0x320] sm:$0xff]  ;;  %v350_v56 = vadd.f32 %v349_v38, %v1535_v14  ;;  %v1574_v38 = vld [vmem:[%s1329_s10 + $0x108] sm:$0xff]  ;;  %v433_v36 = vadd.f32 %v432_v1, %v1552_v49 }
  0x5f   : > { %v646_v22 = vmax.f32 %v645_v21, %v308_v61  ;;  %1895 = vst [vmem:[#allocation18_spill] sm:$0xff] %v1574_v38  ;;  %v631_v21 = vmax.f32 %v630_v29, %v1457_v60  ;;  %v1591_v29 = vld [vmem:[%s1329_s10 + $0xe0] sm:$0xff]  ;;  %v371_v23 = vadd.f32 %v1574_v38, %v1571_v6  ;;  %v442_v4 = vadd.f32 %v441_v2, %v308_v61  ;;  %v1606_v6 = vld [vmem:[%s1329_s10 + $0xe8] sm:$0xff] }
  0x60   : > { %420 = vadd.xlane.f32.xlu1 %v419_v24  ;;  %v362_v24 = vadd.f32 %v361_v57, %v1545_v9  ;;  %v351_v16 = vadd.f32 %v350_v56, %v1549_v44  ;;  %v1584_v57 = vld [vmem:[%s1329_s10 + $0x2f0] sm:$0xff]  ;;  %v434_v60 = vadd.f32 %v433_v36, %v1567_v0  ;;  %v244_v1 = vld [vmem:[%s1329_s10 + $0x120] sm:$0xff]  ;;  %v323_v36 = vld [vmem:[%s1329_s10 + $0x398] sm:$0xff]  ;;  %v565_v2 = vmax.f32 %v564_v5, %v1524_v15 }
  0x61   : > { %v647_v56 = vmax.f32 %v646_v22, %v309_v3  ;;  %v632_v22 = vmax.f32 %v631_v21, %v1472_v10  ;;  %v372_v41 = vadd.f32 %v371_v23, %v242_v7  ;;  %v1618_v10 = vld [vmem:[%s1329_s10 + $0x388] sm:$0xff]  ;;  %v324_v21 = vld [vmem:[%s1329_s10 + $0x3a0] sm:$0xff]  ;;  %v1623_v7 = vld [vmem:[%s1329_s10 + $0xf0] sm:$0xff] }
  0x62   : > { %v363_v51 = vadd.f32 %v362_v24, %v1561_v19  ;;  %352 = vadd.xlane.f32.xlu0 %v351_v16  ;;  %v578_v16 = vmax.f32 %v577_v35, %v244_v1  ;;  %v322_v24 = vld [vmem:[%s1329_s10 + $0x390] sm:$0xff]  ;;  %v435_v33 = vadd.f32 %v434_v60, %v1584_v57  ;;  %v443_v35 = vadd.f32 %v442_v4, %v309_v3  ;;  %v245_v23 = vld [vmem:[%s1329_s10 + $0x128] sm:$0xff] }
  0x63   : > { %v662_v38 = vmax.f32 %v323_v36, %v322_v24  ;;  %1897 = vst [vmem:[#allocation20_spill] sm:$0xff] %v1618_v10  ;;  %v373_v15 = vadd.f32 %v372_v41, %v243_v43  ;;  %v325_v52 = vld [vmem:[%s1329_s10 + $0x3a8] sm:$0xff]  ;;  %v326_v41 = vld [vmem:[%s1329_s10 + $0x3b0] sm:$0xff] }
  0x64   : > { %v364_v55 = vadd.f32 %v363_v51, %v1580_v34  ;;  %v1610_v51 = vmax.f32 %v615_v26, %v1403_v30  ;;  %v436_v60 = vadd.f32 %v435_v33, %v1598_v58  ;;  %v648_v30 = vmax.f32 %v647_v56, %v310_v42  ;;  %v311_v26 = vld [vmem:[%s1329_s10 + $0x338] sm:$0xff]  ;;  %v312_v56 = vld [vmem:[%s1329_s10 + $0x340] sm:$0xff] }
  0x65   : > { %v663_v5 = vmax.f32 %v662_v38, %v324_v21  ;;  %v444_v4 = vadd.f32 %v443_v35, %v310_v42  ;;  %v579_v11 = vmax.f32 %v578_v16, %v245_v23  ;;  %v633_v33 = vmax.f32 %v632_v22, %v1487_v32  ;;  %v246_v42 = vld [vmem:[%s1329_s10 + $0x130] sm:$0xff] }
  0x66   : > { %v365_v61 = vadd.f32 %v364_v55, %v1591_v29  ;;  %v548_v55 = vmax.f32 %v547_v27, %v1438_v50  ;;  %437 = vadd.xlane.f32.xlu1 %v436_v60  ;;  %v374_v43 = vadd.f32 %v373_v15, %v244_v1  ;;  %v456_v38 = vadd.f32 %v1618_v10, %v1615_v12  ;;  %v258_v12 = vld [vmem:[%s1329_s10 + $0x190] sm:$0xff]  ;;  %v259_v27 = vld [vmem:[%s1329_s10 + $0x198] sm:$0xff] }
  0x67   : > { %v664_v50 = vmax.f32 %v663_v5, %v325_v52  ;;  %v566_v16 = vmax.f32 %v565_v2, %v1545_v9  ;;  %v445_v22 = vadd.f32 %v444_v4, %v311_v26  ;;  %v649_v1 = vmax.f32 %v648_v30, %v311_v26  ;;  %v1650_v5 = vld [vmem:[%s1329_s10 + $0x188] sm:$0xff]  ;;  %v247_v4 = vld [vmem:[%s1329_s10 + $0x138] sm:$0xff]  ;;  %v314_v26 = vld [vmem:[%s1329_s10 + $0x350] sm:$0xff] }
  0x68   : > { %v366_v3 = vadd.f32 %v365_v61, %v1606_v6  ;;  %v1647_v61 = vld [vmem:[%s1329_s10 + $0x180] sm:$0xff]  ;;  %v375_v35 = vadd.f32 %v374_v43, %v245_v23  ;;  %v457_v15 = vadd.f32 %v456_v38, %v322_v24  ;;  %v594_v10 = vmax.f32 %v259_v27, %v258_v12 }
  0x69   : > { %v665_v60 = vmax.f32 %v664_v50, %v326_v41  ;;  %v446_v2 = vadd.f32 %v445_v22, %v312_v56  ;;  %v549_v28 = vmax.f32 %v548_v55, %v1454_v59  ;;  %v634_v30 = vmax.f32 %v633_v33, %v1501_v48  ;;  %v260_v43 = vld [vmem:[%s1329_s10 + $0x1a0] sm:$0xff]  ;;  %v1667_v48 = vld [vmem:[%s1329_s10 + $0x358] sm:$0xff] }
  0x6a   : > { %v367_v32 = vadd.f32 %v366_v3, %v1623_v7  ;;  %v580_v3 = vmax.f32 %v579_v11, %v246_v42  ;;  %v376_v24 = vadd.f32 %v375_v35, %v246_v42  ;;  %v458_v23 = vadd.f32 %v457_v15, %v323_v36  ;;  %v327_v11 = vld [vmem:[%s1329_s10 + $0x3b8] sm:$0xff]  ;;  %v1671_v15 = vld [vmem:[%s1329_s10 + $0x148] sm:$0xff] }
  0x6b   : > { %v567_v50 = vmax.f32 %v566_v16, %v1561_v19  ;;  %v447_v38 = vadd.f32 %v446_v2, %v1636_v13  ;;  %v595_v22 = vmax.f32 %v594_v10, %v260_v43  ;;  %v388_v59 = vadd.f32 %v1650_v5, %v1647_v61  ;;  %v261_v19 = vld [vmem:[%s1329_s10 + $0x1a8] sm:$0xff] }
  0x6c   : > { %v368_v9 = vadd.f32 %v367_v32, %v1632_v20  ;;  %v248_v32 = vld [vmem:[%s1329_s10 + $0x140] sm:$0xff]  ;;  %v650_v55 = vmax.f32 %v649_v1, %v312_v56  ;;  %v377_v33 = vadd.f32 %v376_v24, %v247_v4  ;;  %v666_v36 = vmax.f32 %v665_v60, %v327_v11 }
  0x6d   : > { %v459_v42 = vadd.f32 %v458_v23, %v324_v21  ;;  %v448_v16 = vadd.f32 %v447_v38, %v314_v26  ;;  %v581_v35 = vmax.f32 %v580_v3, %v247_v4  ;;  %v389_v10 = vadd.f32 %v388_v59, %v258_v12  ;;  %v1676_v1 = vld [vmem:[%s1329_s10 + $0x360] sm:$0xff]  ;;  %v262_v21 = vld [vmem:[%s1329_s10 + $0x1b0] sm:$0xff]  ;;  %v263_v59 = vld [vmem:[%s1329_s10 + $0x1b8] sm:$0xff] }
  0x6e   : > { %369 = vadd.xlane.f32.xlu0 %v368_v9  ;;  %v596_v9 = vmax.f32 %v595_v22, %v261_v19  ;;  %v550_v2 = vmax.f32 %v549_v28, %v1469_v8  ;;  %v635_v56 = vmax.f32 %v634_v30, %v1517_v62  ;;  %v378_v24 = vadd.f32 %v377_v33, %v248_v32  ;;  %v250_v4 = vld [vmem:[%s1329_s10 + $0x150] sm:$0xff]  ;;  %v328_v38 = vld [vmem:[%s1329_s10 + $0x3c0] sm:$0xff]  ;;  %v1685_v8 = vld [vmem:[%s1329_s10 + $0x368] sm:$0xff] }
  0x6f   : > { %v460_v60 = vadd.f32 %v459_v42, %v325_v52  ;;  %v568_v23 = vmax.f32 %v567_v50, %v1580_v34  ;;  %v449_v3 = vadd.f32 %v448_v16, %v1667_v48  ;;  %v390_v12 = vadd.f32 %v389_v10, %v259_v27  ;;  %v1691_v33 = vld [vmem:[%s1329_s10 + $0x158] sm:$0xff]  ;;  %v1705_v10 = vld [vmem:[%s1329_s10 + $0x160] sm:$0xff] }
  0x70   : > { %v597_v22 = vmax.f32 %v596_v9, %v262_v21  ;;  %v651_v28 = vmax.f32 %v650_v55, %v1636_v13  ;;  %v379_v62 = vadd.f32 %v378_v24, %v1671_v15  ;;  %v667_v30 = vmax.f32 %v666_v36, %v328_v38  ;;  %v1699_v36 = vld [vmem:[%s1329_s10 + $0x370] sm:$0xff]  ;;  %v329_v24 = vld [vmem:[%s1329_s10 + $0x3c8] sm:$0xff] }
  0x71   : > { %v461_v52 = vadd.f32 %v460_v60, %v326_v41  ;;  %v450_v34 = vadd.f32 %v449_v3, %v1676_v1  ;;  %v582_v50 = vmax.f32 %v581_v35, %v248_v32  ;;  %v391_v16 = vadd.f32 %v390_v12, %v260_v43  ;;  %v264_v60 = vld [vmem:[%s1329_s10 + $0x1c0] sm:$0xff] }
  0x72   : > { %v598_v42 = vmax.f32 %v597_v22, %v263_v59  ;;  %v1898_v13 = vmax.f32 %v1610_v51, %v1416_v37  ;;  %v551_v55 = vmax.f32 %v550_v2, %v1484_v31  ;;  %v380_v41 = vadd.f32 %v379_v62, %v250_v4  ;;  %v1709_v51 = vld [vmem:[%s1329_s10 + $0x378] sm:$0xff] }
  0x73   : > { %v462_v9 = vadd.f32 %v461_v52, %v327_v11  ;;  %v636_v32 = vmax.f32 %v635_v56, %v1538_v18  ;;  %v569_v35 = vmax.f32 %v568_v23, %v1591_v29  ;;  %v451_v43 = vadd.f32 %v450_v34, %v1685_v8  ;;  %v1716_v56 = vld [vmem:[%s1329_s10 + $0x168] sm:$0xff]  ;;  %v330_v23 = vld [vmem:[%s1329_s10 + $0x3d0] sm:$0xff] }
  0x74   : > { %v618_v27 = vmax.f32 %v1898_v13, %v1421_v40  ;;  %v392_v37 = vadd.f32 %v391_v16, %v261_v19  ;;  %v652_v40 = vmax.f32 %v651_v28, %v314_v26  ;;  %v381_v31 = vadd.f32 %v380_v41, %v1691_v33  ;;  %v332_v13 = vld [vmem:[%s1329_s10 + $0x3e0] sm:$0xff] }
  0x75   : > { %v668_v2 = vmax.f32 %v667_v30, %v329_v24  ;;  %v463_v11 = vadd.f32 %v462_v9, %v328_v38  ;;  %v452_v18 = vadd.f32 %v451_v43, %v1699_v36  ;;  %v583_v29 = vmax.f32 %v582_v50, %v1671_v15  ;;  %v1725_v15 = vld [vmem:[%s1329_s10 + $0x170] sm:$0xff]  ;;  %v331_v30 = vld [vmem:[%s1329_s10 + $0x3d8] sm:$0xff] }
  0x76   : > { %v599_v3 = vmax.f32 %v598_v42, %v264_v60  ;;  %v393_v19 = vadd.f32 %v392_v37, %v262_v21  ;;  %v619_v26 = vmax.f32 %v618_v27, %v1446_v53  ;;  %v382_v22 = vadd.f32 %v381_v31, %v1705_v10  ;;  %v265_v42 = vld [vmem:[%s1329_s10 + $0x1c8] sm:$0xff]  ;;  %v266_v9 = vld [vmem:[%s1329_s10 + $0x1d0] sm:$0xff]  ;;  %v267_v31 = vld [vmem:[%s1329_s10 + $0x1d8] sm:$0xff] }
  0x77   : > { %v464_v12 = vadd.f32 %v463_v11, %v329_v24  ;;  %v637_v38 = vmax.f32 %v636_v32, %v1552_v49  ;;  %v570_v28 = vmax.f32 %v569_v35, %v1606_v6  ;;  %v453_v62 = vadd.f32 %v452_v18, %v1709_v51  ;;  %v1733_v6 = vld [vmem:[%s1329_s10 + $0x178] sm:$0xff]  ;;  %v268_v18 = vld [vmem:[%s1329_s10 + $0x1e0] sm:$0xff] }
  0x78   : > { %v394_v52 = vadd.f32 %v393_v19, %v263_v59  ;;  %v653_v21 = vmax.f32 %v652_v40, %v1667_v48  ;;  %v383_v53 = vadd.f32 %v382_v22, %v1716_v56  ;;  %v669_v34 = vmax.f32 %v668_v2, %v330_v23 }
  0x79   : > { %v465_v50 = vadd.f32 %v464_v12, %v330_v23  ;;  %v552_v16 = vmax.f32 %v551_v55, %v1498_v45  ;;  %454 = vadd.xlane.f32.xlu1 %v453_v62  ;;  %v584_v49 = vmax.f32 %v583_v29, %v250_v4  ;;  %v600_v27 = vmax.f32 %v599_v3, %v265_v42  ;;  %v333_v55 = vld [vmem:[%s1329_s10 + $0x3e8] sm:$0xff]  ;;  %v335_v23 = vld [vmem:[%s1329_s10 + $0x3f8] sm:$0xff] }
  0x7a   : > { %v395_v41 = vadd.f32 %v394_v52, %v264_v60  ;;  %v384_v59 = vadd.f32 %v383_v53, %v1725_v15  ;;  %v620_v32 = vmax.f32 %v619_v26, %v1460_v63  ;;  %v638_v35 = vmax.f32 %v637_v38, %v1567_v0  ;;  %v334_v63 = vld [vmem:[%s1329_s10 + $0x3f0] sm:$0xff]  ;;  %v269_v12 = vld [vmem:[%s1329_s10 + $0x1e8] sm:$0xff] }
  0x7b   : > { %v466_v48 = vadd.f32 %v465_v50, %v331_v30  ;;  %v571_v45 = vmax.f32 %v570_v28, %v1623_v7  ;;  %v654_v43 = vmax.f32 %v653_v21, %v1676_v1  ;;  %v670_v37 = vmax.f32 %v669_v34, %v331_v30  ;;  %v270_v30 = vld [vmem:[%s1329_s10 + $0x1f0] sm:$0xff] }
  0x7c   : > { %v396_v4 = vadd.f32 %v395_v41, %v265_v42  ;;  %v385_v24 = vadd.f32 %v384_v59, %v1733_v6  ;;  %v553_v2 = vmax.f32 %v552_v16, %v1507_v54  ;;  %v585_v11 = vmax.f32 %v584_v49, %v1691_v33  ;;  %v1903_v59 = vld [vmem:[#allocation14_spill] sm:$0xff] }
  0x7d   : > { %v467_v40 = vadd.f32 %v466_v48, %v332_v13  ;;  %v601_v0 = vmax.f32 %v600_v27, %v266_v9  ;;  %v621_v29 = vmax.f32 %v620_v32, %v1475_v17  ;;  %v639_v1 = vmax.f32 %v638_v35, %v1584_v57  ;;  %v1902_v27 = vld [vmem:[#allocation15_spill] sm:$0xff]  ;;  %v1905_v32 = vld [vmem:[#allocation12_spill] sm:$0xff] }
  0x7e   : > { %v397_v60 = vadd.f32 %v396_v4, %v266_v9  ;;  %386 = vadd.xlane.f32.xlu0 %v385_v24  ;;  %v559_v19 = vmax.f32 %v1430_v46, %v1433_v47  ;;  %v572_v54 = vmax.f32 %v571_v45, %v1632_v20  ;;  %v655_v33 = vmax.f32 %v654_v43, %v1685_v8  ;;  %v271_v8 = vld [vmem:[%s1329_s10 + $0x1f8] sm:$0xff] }
  0x7f   : > { %v468_v7 = vadd.f32 %v467_v40, %v333_v55  ;;  %v671_v26 = vmax.f32 %v670_v37, %v332_v13  ;;  %v554_v38 = vmax.f32 %v553_v2, %v1535_v14  ;;  %v586_v28 = vmax.f32 %v585_v11, %v1705_v10  ;;  %v1907_v4 = vld [vmem:[#allocation20_spill] sm:$0xff]  ;;  %v1908_v43 = vld [vmem:[#allocation19_spill] sm:$0xff]  ;;  %v1909_v40 = vld [vmem:[#allocation9_spill] sm:$0xff] }
  0x80   : > { %v398_v3 = vadd.f32 %v397_v60, %v267_v31  ;;  %v602_v17 = vmax.f32 %v601_v0, %v267_v31  ;;  %v622_v52 = vmax.f32 %v621_v29, %v1490_v39  ;;  %v640_v46 = vmax.f32 %v639_v1, %v1598_v58  ;;  %v1899_v39 = vld [vmem:[#allocation13_spill] sm:$0xff]  ;;  %v1910_v31 = vld [vmem:[#allocation10_spill] sm:$0xff] }
  0x81   : > { %v469_v22 = vadd.f32 %v468_v7, %v334_v63  ;;  %v656_v47 = vmax.f32 %v655_v33, %v1699_v36  ;;  %v672_v20 = vmax.f32 %v671_v26, %v333_v55  ;;  %v573_v53 = vmax.f32 %v572_v54, %v559_v19  ;;  %v1901_v36 = vld [vmem:[#allocation16_spill] sm:$0xff]  ;;  %v1912_v11 = vld [vmem:[#allocation18_spill] sm:$0xff] }
  0x82   : > { %v399_v62 = vadd.f32 %v398_v3, %v268_v18  ;;  %v555_v34 = vmax.f32 %v554_v38, %v1549_v44  ;;  %v587_v14 = vmax.f32 %v586_v28, %v1716_v56  ;;  %v603_v10 = vmax.f32 %v602_v17, %v268_v18  ;;  %v1904_v56 = vld [vmem:[#allocation11_spill] sm:$0xff] }
  0x83   : > { %v470_v57 = vadd.f32 %v469_v22, %v335_v23  ;;  %v657_v16 = vmax.f32 %v656_v47, %v1709_v51  ;;  %v673_v49 = vmax.f32 %v672_v20, %v334_v63  ;;  %v1900_v58 = vmax.f32 %v1390_v25, %v1899_v39  ;;  %v1913_v63 = vld [vmem:[#allocation17_spill] sm:$0xff] }
  0x84   : > { %v400_v21 = vadd.f32 %v399_v62, %v269_v12  ;;  %v644_v41 = vmax.f32 %v1902_v27, %v1901_v36  ;;  %v623_v48 = vmax.f32 %v622_v52, %v1903_v59  ;;  %v588_v44 = vmax.f32 %v587_v14, %v1725_v15 }
  0x85   : > { %471 = vadd.xlane.f32.xlu1 %v470_v57  ;;  %v641_v13 = vmax.f32 %v640_v46, %v1900_v58  ;;  %v604_v9 = vmax.f32 %v603_v10, %v269_v12  ;;  %v1906_v35 = vmax.f32 %v1904_v56, %v1905_v32  ;;  %v674_v51 = vmax.f32 %v673_v49, %v335_v23  ;;  %v336_v56 = vld [vmem:[#allocation2] sm:$0x3] }
  0x86   : > { %v401_v50 = vadd.f32 %v400_v21, %v270_v30  ;;  %v658_v55 = vmax.f32 %v657_v16, %v644_v41  ;;  %v661_v25 = vmax.f32 %v1908_v43, %v1907_v4  ;;  %v589_v24 = vmax.f32 %v588_v44, %v1733_v6 }
  0x87   : > { %v556_v45 = vmax.f32 %v555_v34, %v1906_v35  ;;  %v605_v37 = vmax.f32 %v604_v9, %v270_v30  ;;  %v1911_v2 = vmax.f32 %v1909_v40, %v1910_v31  ;;  %v576_v0 = vmax.f32 %v1913_v63, %v1912_v11 }
  0x88   : > { %v402_v42 = vadd.f32 %v401_v50, %v271_v8  ;;  %v675_v60 = vmax.f32 %v674_v51, %v661_v25  ;;  %v593_v29 = vmax.f32 %v1647_v61, %v1650_v5  ;;  %v489_v3 = vlaneseq }
  0x89   : > { %574 = vmax.xlane.f32.xlu1 %v573_v53  ;;  %v624_v15 = vmax.f32 %v623_v48, %v1911_v2  ;;  %v606_v7 = vmax.f32 %v605_v37, %v271_v8  ;;  %v590_v18 = vmax.f32 %v589_v24, %v576_v0 }
  0x8a   : > { %403 = vadd.xlane.f32.xlu0 %v402_v42  ;;  %v490_v54 = vand.u32 127, %v489_v3  ;;  %v492_v38 = vshrl.u32 %v489_v3, 7 }
  0x8b   : > { %v607_v6 = vmax.f32 %v606_v7, %v593_v29 }
  0x8c   : > { %v495_v26 = vadd.s32 4294967288, %v490_v54  ;;  %v502_v12 = vadd.s32 4294967280, %v490_v54  ;;  %v509_v28 = vadd.s32 4294967272, %v490_v54  ;;  %v493_v5 = vsub.s32 %v490_v54, %v492_v38  ;;  %v733_v54 = vld [vmem:[%s1867_s1] sm:$0xff] (!%p978_p7) }
  0x8d   : > { %642 = vmax.xlane.f32.xlu1 %v641_v13 }
  0x8e   : > { %557 = vmax.xlane.f32.xlu0 %v556_v45  ;;  %v498_v17 = vsub.s32 %v495_v26, %v492_v38  ;;  %v505_v30 = vsub.s32 %v502_v12, %v492_v38  ;;  %v512_v46 = vsub.s32 %v509_v28, %v492_v38  ;;  %v735_v26 = vld [vmem:[%s1867_s1 + $0x10] sm:$0xff] (!%p978_p7)  ;;  %v736_v38 = vld [vmem:[%s1867_s1 + $0x18] sm:$0xff] (!%p978_p7)  ;;  %v1206_v28 = vmov (!%p978_p7), 0.0  }
  0x8f   : > { %1002 = vmatprep.mubr.msk.f32.mxu0 (!%p978_p7), %vm1205_vm6, %v1206_v28  ;;  %1005 = vmatprep.subr.mxu1 (!%p978_p7), %v1206_v28 }
  0x90   : > { %1007 = vmatprep.mubr.msk.f32.mxu1 (!%p978_p7), %vm1205_vm6, %v1206_v28 }
  0x91   : > { %659 = vmax.xlane.f32.xlu1 %v658_v55 }
  0x92   : > { %625 = vmax.xlane.f32.xlu0 %v624_v15 }
  0x95   : > { %676 = vmax.xlane.f32.xlu1 %v675_v60 }
  0x96   : > { %591 = vmax.xlane.f32.xlu0 %v590_v18 }
  0x9a   : > { %608 = vmax.xlane.f32.xlu0 %v607_v6 }
  0xed   : > { %v421_v1 = vpop.xlane.xlu1 %420 }
  0xee   : > { %v477_v52 = vmul.f32 0.00024414063, %v421_v1  ;;  %v541_v1 = vld [vmem:[#allocation2 + $0x2] sm:$0x3] }
  0xef   : > { %v353_v23 = vpop.xlane.xlu0 %352 }
  0xf0   : > { %v473_v53 = vmul.f32 0.00024414063, %v353_v23  ;;  %v519_v10 = vrot.slane %v477_v52, %v493_v5 }
  0xf2   : > { %v494_v58 = vrot.slane %v473_v53, %v493_v5 }
  0xf3   : > { %v438_v19 = vpop.xlane.xlu1 %437 }
  0xf4   : > { %v478_v62 = vmul.f32 0.00024414063, %v438_v19 }
  0xf6   : > { %v523_v34 = vrot.slane %v478_v62, %v498_v17 }
  0xf8   : > { %v524_v13 = vsel %vm500_vm1, %v523_v34, %v519_v10 }
  0xfb   : > { %v370_v33 = vpop.xlane.xlu0 %369 }
  0xfc   : > { %v474_v21 = vmul.f32 0.00024414063, %v370_v33  ;;  %v734_v33 = vld [vmem:[%s1867_s1 + $0x8] sm:$0xff] (!%p978_p7) }
  0xfd   : > { %v1011_v12 = vpack.c.bf16 (!%p978_p7), %v734_v33, %v733_v54 }
  0xfe   : > { %v499_v50 = vrot.slane %v474_v21, %v498_v17 }
 0x100   : > { %v501_v41 = vsel %vm500_vm1, %v499_v50, %v494_v58 }
 0x106   : > { %v455_v22 = vpop.xlane.xlu1 %454 }
 0x107   : > { %v479_v61 = vmul.f32 0.00024414063, %v455_v22  ;;  %v1204_v22 = vmov (!%p978_p7), 0.0|0.0  }
 0x108   : > { %1010 = vmatprep.subr.bf16.mxu0 (!%p978_p7), %v1204_v22 }
 0x109   : > { %v528_v14 = vrot.slane %v479_v61, %v505_v30  ;;  %1012 = vmatpush3.bf16.msra.mxu0 (!%p978_p7), %v1011_v12 }
 0x10a   : > { %1013 = vmatprep.subr.bf16.mxu0 (!%p978_p7), %v1204_v22 }
 0x10b   : > { %v387_v57 = vpop.xlane.xlu0 %386  ;;  %v529_v27 = vsel %vm507_vm2, %v528_v14, %v524_v13 }
 0x10c   : > { %v475_v20 = vmul.f32 0.00024414063, %v387_v57  ;;  %v812_v57 = vld [vmem:[%s1868_s2] sm:$0xf] (!%p978_p7) }
 0x10d   : > { %1006 = vmatpush3.msk.msra.mxu1 (!%p978_p7), %vm817_vm8, %v812_v57 }
 0x10e   : > { %v506_v49 = vrot.slane %v475_v20, %v505_v30 }
 0x110   : > { %v508_v9 = vsel %vm507_vm2, %v506_v49, %v501_v41 }
 0x112   : > { %v472_v47 = vpop.xlane.xlu1 %471 }
 0x113   : > { %v480_v8 = vmul.f32 0.00024414063, %v472_v47 }
 0x115   : > { %v533_v42 = vrot.slane %v480_v8, %v512_v46 }
 0x116   : > { %v575_v16 = vpop.xlane.xlu1 %574 }
 0x117   : > { %v404_v39 = vpop.xlane.xlu0 %403  ;;  %v534_v59 = vsel %vm514_vm3, %v533_v42, %v529_v27  ;;  %v693_v31 = vrot.slane %v575_v16, %v498_v17 }
 0x118   : > { %v476_v36 = vmul.f32 0.00024414063, %v404_v39 }
 0x11a   : > { %v513_v48 = vrot.slane %v476_v36, %v512_v46  ;;  %v643_v44 = vpop.xlane.xlu1 %642 }
 0x11b   : > { %v558_v32 = vpop.xlane.xlu0 %557  ;;  %v712_v43 = vrot.slane %v643_v44, %v498_v17  ;;  %v1014_v17 = vpack.c.bf16 (!%p978_p7), %v736_v38, %v735_v26 }
 0x11c   : > { %v515_v35 = vsel %vm514_vm3, %v513_v48, %v508_v9  ;;  %v689_v2 = vrot.slane %v558_v32, %v493_v5 }
 0x11d   : > { %v536_v45 = vsel %vm535_vm4, %v534_v59, %v515_v35  ;;  %1015 = vmatpush3.bf16.msra.mxu0 (!%p978_p7), %v1014_v17 }
 0x11e   : > { %v538_v51 = vadd.f32 %v536_v45, %v336_v56  ;;  %v660_v55 = vpop.xlane.xlu1 %659  ;;  %v694_v7 = vsel %vm500_vm1, %v693_v31, %v689_v2 }
 0x11f   : > { %v626_v4 = vpop.xlane.xlu0 %625  ;;  %v717_v37 = vrot.slane %v660_v55, %v505_v30 }
 0x120   : > { %540 = vst.msk [vmem:[#allocation2] sm:$0x3] %vm539_vm5, %v538_v51  ;;  %v708_v25 = vrot.slane %v626_v4, %v493_v5 }
 0x122   : > { %v677_v24 = vpop.xlane.xlu1 %676  ;;  %v713_v63 = vsel %vm500_vm1, %v712_v43, %v708_v25 }
 0x123   : > { %v592_v40 = vpop.xlane.xlu0 %591  ;;  %v722_v15 = vrot.slane %v677_v24, %v512_v46  ;;  %v718_v0 = vsel %vm507_vm2, %v717_v37, %v713_v63 }
 0x124   : > { %v698_v11 = vrot.slane %v592_v40, %v505_v30 }
 0x125   : > { %v723_v18 = vsel %vm514_vm3, %v722_v15, %v718_v0 }
 0x126   : > { %v699_v6 = vsel %vm507_vm2, %v698_v11, %v694_v7 }
 0x127   : > { %v609_v60 = vpop.xlane.xlu0 %608 }
 0x128   : > { %v703_v29 = vrot.slane %v609_v60, %v512_v46  ;;  %731 = sbr.rel (%p978_p7) target bundleno = 741 (0x2e5), region = 44 }
 0x12a   : > { %v704_v23 = vsel %vm514_vm3, %v703_v29, %v699_v6 }
 0x12b   : > { %v724_v3 = vsel %vm535_vm4, %v723_v18, %v704_v23 }
 0x12c   : > { %v726_v19 = vmax.f32 %v541_v1, %v724_v3 }
 0x12e   : > { %727 = vst.msk [vmem:[#allocation2 + $0x2] sm:$0x3] %vm539_vm5, %v726_v19 }
 0x135   : > { %v732_v62 = vld [vmem:[#allocation2] sm:$0xf] }
 0x136   : > { %1003 = vmatmul.mubr.msk.f32.vlgmr.msra.gmra.mrb[0].mxu0 %vm737_vm7, %v732_v62 }
 0x209   : > { %v807_v30 = vpop.f32.mrb[0].mxu0 }
 0x20a   : > { %v811_v61 = vmax.f32 %v807_v30, 0.0  ;;  %v1004_v5 = vpop.f32.mrb[1].mxu0 }
 0x20c   : > { %1008 = vmatmul.mubr.msk.f32.vlgmr.msra.gmra.mrb[0].mxu1 %vm813_vm9, %v811_v61 }
 0x2df   : > { %v887_v52 = vpop.f32.mrb[0].mxu1 }
 0x2e0   : > { %v892_v21 = vrot.slane %v887_v52, 2  ;;  %v1009_v46 = vpop.f32.mrb[1].mxu1 }
 0x2e2   : > { %v894_v47 = vadd.f32 %v892_v21, %v887_v52 }
 0x2e4   : > { %895 = vst.msk [vmem:[#allocation6] sm:$0x3] %vm539_vm5, %v894_v47 }
 0x2e5 PF: > { %p1822_p9 = scmp.eq.s32.totalorder %s969_s18, 1  ;;  %s1207_s25 = smov [#allocation6]  }
 0x2e6   : > { %s905_s26 = sshll.u32 %s1207_s25, 4  ;;  %s906_s26 = int_to_ptr.vmem [resolvable:$true] %s905_s26 }
 0x2e7   : > { %s1116_s27 = scalar_lea.vmem %s906_s26, 32  ;;  %p1123_p11 = scmp.lt.s32.totalorder %s906_s26, %s906_s26 }
 0x2e8   : > { %p1117_p5 = scmp.ne.s32.totalorder %s906_s26, %s1116_s27  ;;  %p1124_p13 = scmp.lt.s32.totalorder %s1116_s27, %s1116_s27 }
 0x2ea   : > { %p1118_p6 = pnand %p1117_p5, %p1822_p9  ;;  %p1125_p1 = por %p1124_p13, %p1123_p11 }
 0x2ec   : > { %p1119_p8 = pneg %p1118_p6 }
 0x2ee   : > { %p1126_p2 = pnand %p1125_p1, %p1119_p8 }
 0x2f0   : > { %1129 = shalt.err (!%p1126_p2)
}
 0x2f1   : > { %s1130_s18 = scalar_lea.hbm %s1869_s3, 32 }
 0x2f2   : > { %p1131_p3 = scmp.ne.s32.totalorder %s1869_s3, %s1130_s18  ;;  %p1136_p4 = scmp.lt.u32.totalorder %s1130_s18, %s1869_s3 }
 0x2f4   : > { %p1132_p12 = pnand %p1131_p3, %p1822_p9 }
 0x2f6   : > { %p1133_p0 = pneg %p1132_p12 }
 0x2f8   : > { %p1138_p10 = pnand %p1136_p4, %p1133_p0 }
 0x2fa   : > { %1141 = shalt.err (!%p1138_p10)
}
 0x2fb   : > { %1019 = dma.vmem_to_hbm [thread:$0]  (%p1822_p9), %s906_s26, 32, %s1869_s3, [#allocation5]  }
 0x2fc   : > { %1171 = dma.done.wait (%p1822_p9), [#allocation5], 32  }
 0x2fd   : > { %1173 = vsyncadd (%p1822_p9), [#allocation5], 4294967264 }
 0x2fe PF: > { %s17_s17 = sadd.s32 1, %s1196_s17   ;;  %s1915_s12 = smov %s1180_s13 }
 0x2ff   : > { %p14_p7 = scmp.ge.s32.totalorder %s17_s17, 4   ;;  %s1916_s13 = smov %s1184_s14 }
 0x300   : > { %s1917_s14 = smov %s1279_s24  ;;  %s1918_s15 = smov %s1192_s16 }
 0x301   : > { %s1919_s16 = smov %s1921_s19  ;;  %16 = sbr.rel (!%p14_p7) target bundleno = 5 (0x5), region = 78 }
 0x308   :  { %918 = vsyncpa [#allocation4], 1 }
 0x309   :  { %920 = vsyncpa [#allocation4 + $0x1], 1 }
 0x30a   :  { %921 = vsyncpa [#allocation5], 1 }
 0x30b   :  { %923 = vsyncpa [#allocation5 + $0x1], 1 }

</bundles_post_ra>
